<compile_context>
chip_gen: v6e
topology: v6e:2x2x1
jax: 0.10.0
libtpu: 0.0.40
codegen_flags: <defaults>
</compile_context>

<pallas_src>
import functools

import jax
import jax.numpy as jnp
from jax import lax
from jax.experimental import pallas as pl
from jax.experimental.pallas import tpu as pltpu


def _round_up(x: int, m: int) -> int:
    return ((x + m - 1) // m) * m


def _choose_tiles(B: int, T: int, Q: int, itemsize: int):
    """Pick (Bt, Tt) so the double-buffered VMEM working set stays <= ~16 MiB."""
    Tt = min(_round_up(T, 128), 2048)                 # lane axis: large multiple of 128
    budget = 16 * 1024 * 1024                         # double-buffered target
    per_row = 2 * (1 + Q) * Tt * itemsize             # bytes per sublane row, dbl-buffered
    max_bt = max(8, (budget // per_row) // 8 * 8)
    Bt = min(_round_up(B, 8), max_bt, 256)            # sublane axis: multiple of 8
    return int(Bt), int(Tt)


def _mql_kernel(y_ref, yhat_ref, out_ref, sum_ref, cnt_ref, *,
                quantiles, masked, valid_b, valid_t):
    """One (Bt, Tt) tile of the masked multi-quantile (pinball) loss.

    y_ref:    [Bt, Tt]    input dtype (NaN-padded when masked)
    yhat_ref: [Q, Bt, Tt] input dtype
    out_ref:  [1, 1] f32  (written on the last grid step only)
    sum_ref / cnt_ref: [1, 1] f32 VMEM scratch accumulators.
    """
    i = pl.program_id(0)
    j = pl.program_id(1)

    @pl.when(jnp.logical_and(i == 0, j == 0))
    def _init():
        sum_ref[...] = jnp.zeros_like(sum_ref)
        cnt_ref[...] = jnp.zeros_like(cnt_ref)

    y = y_ref[...].astype(jnp.float32)                # [Bt, Tt], per-tile upcast
    bt, tt = y.shape

    if masked:
        # ~isnan(y): NaN targets (and NaN padding) drop out of both sum and count.
        valid = jnp.logical_not(jnp.isnan(y))
    else:
        # All in-bounds elements count; NaNs (if any) propagate like torch.mean.
        row = i * bt + lax.broadcasted_iota(jnp.int32, (bt, tt), 0)
        col = j * tt + lax.broadcasted_iota(jnp.int32, (bt, tt), 1)
        valid = jnp.logical_and(row < valid_b, col < valid_t)

    acc = jnp.zeros((bt, tt), dtype=jnp.float32)
    for q_idx, q in enumerate(quantiles):             # unrolled: quantiles are static
        yq = yhat_ref[q_idx].astype(jnp.float32)      # [Bt, Tt]
        diff = jnp.where(valid, y - yq, 0.0)
        # pinball = q*diff if diff > 0 else (q-1)*diff  ==  diff * (q - (diff < 0))
        acc = acc + diff * (q - (diff < 0.0).astype(jnp.float32))

    # Single cross-lane reduction per tile for the loss, one for the count.
    sum_ref[...] += jnp.full((1, 1), jnp.sum(acc), dtype=jnp.float32)
    cnt_ref[...] += jnp.full((1, 1), jnp.sum(valid.astype(jnp.float32)),
                             dtype=jnp.float32)

    last = jnp.logical_and(i == pl.num_programs(0) - 1,
                           j == pl.num_programs(1) - 1)

    @pl.when(last)
    def _finalize():
        denom = cnt_ref[...] * jnp.float32(len(quantiles))
        out_ref[...] = (sum_ref[...] / denom).astype(out_ref.dtype)


@functools.partial(jax.jit,
                   static_argnames=("quantiles", "masked_loss", "tile_b", "tile_t"))
def multi_quantile_loss(y, y_hat, quantiles, masked_loss=True,
                        tile_b=None, tile_t=None):
    """Pallas implementation of MultiQuantileLoss.forward.

    y:     [B, T, 1] float (may contain NaN)
    y_hat: [B, T, Q] float
    returns: scalar float32
    """
    quantiles = tuple(float(q) for q in quantiles)
    B, T, _ = y.shape
    Q = y_hat.shape[-1]
    assert Q == len(quantiles)

    itemsize = jnp.dtype(y_hat.dtype).itemsize
    auto_bt, auto_tt = _choose_tiles(B, T, Q, itemsize)
    Bt = int(tile_b) if tile_b is not None else auto_bt
    Tt = int(tile_t) if tile_t is not None else auto_tt

    nb = pl.cdiv(B, Bt)
    nt = pl.cdiv(T, Tt)
    Bp, Tp = nb * Bt, nt * Tt

    y2 = y[..., 0]                                    # [B, T], keep HBM dtype
    yh = jnp.transpose(y_hat, (2, 0, 1))              # [Q, B, T], keep HBM dtype
    # TODO(synk): if the producer can emit y_hat as [Q, B, T] directly, drop this
    # transpose -- it is a full extra HBM pass over the largest tensor.

    if (Bp, Tp) != (B, T):
        pad_val = float("nan") if masked_loss else 0.0
        y2 = jnp.pad(y2, ((0, Bp - B), (0, Tp - T)), constant_values=pad_val)
        yh = jnp.pad(yh, ((0, 0), (0, Bp - B), (0, Tp - T)))

    kernel = functools.partial(
        _mql_kernel,
        quantiles=quantiles,
        masked=bool(masked_loss),
        valid_b=B,
        valid_t=T,
    )

    tile_bytes = 2 * (1 + Q) * Bt * Tt * itemsize     # double-buffered input slabs
    vmem_limit = int(min(64 * 1024 * 1024,
                         max(32 * 1024 * 1024, tile_bytes + (4 << 20))))

    out = pl.pallas_call(
        kernel,
        out_shape=jax.ShapeDtypeStruct((1, 1), jnp.float32),
        grid=(nb, nt),                                # T (lane) axis innermost
        in_specs=[
            pl.BlockSpec((Bt, Tt), lambda i, j: (i, j)),
            pl.BlockSpec((Q, Bt, Tt), lambda i, j: (0, i, j)),
        ],
        out_specs=pl.BlockSpec((1, 1), lambda i, j: (0, 0)),
        scratch_shapes=[
            pltpu.VMEM((1, 1), jnp.float32),          # running pinball sum
            pltpu.VMEM((1, 1), jnp.float32),          # running valid count
        ],
        compiler_params=pltpu.CompilerParams(
            dimension_semantics=("arbitrary", "arbitrary"),
            vmem_limit_bytes=vmem_limit,
        ),
    )(y2, yh)
    return out[0, 0]


def _reference_loss(y, y_hat, quantiles, masked_loss=True):
    """Pure-JAX reference mirroring the PyTorch forward."""
    if masked_loss:
        nan_mask = ~jnp.isnan(y)
    else:
        nan_mask = jnp.ones_like(y, dtype=bool)
    n_valid = jnp.sum(nan_mask)
    losses = 0.0
    for i, q in enumerate(quantiles):
        yq = y_hat[:, :, i][..., None]
        diff = y - yq
        mask = diff > 0
        vals = q * diff * mask - (1.0 - q) * diff * (~mask)
        losses = losses + jnp.sum(jnp.where(nan_mask, vals, 0.0)) / n_valid
    return losses / len(quantiles)


if __name__ == "__main__":
    quantiles = (0.1, 0.5, 0.9)
    Q = len(quantiles)
    key = jax.random.PRNGKey(0)
    k1, k2, k3, k4 = jax.random.split(key, 4)

    # Case 1: tiny shape with NaN targets (masked path, single tile).
    B1, T1 = 2, 8
    y1 = jax.random.normal(k1, (B1, T1, 1), dtype=jnp.float32)
    y1 = y1.at[0, 3, 0].set(jnp.nan)
    y1 = y1.at[1, 5, 0].set(jnp.nan)
    yh1 = jax.random.normal(k2, (B1, T1, Q), dtype=jnp.float32)

    loss1 = jax.block_until_ready(multi_quantile_loss(y1, yh1, quantiles))
    ref1 = jax.block_until_ready(_reference_loss(y1, yh1, quantiles))
    assert jnp.allclose(loss1, ref1, rtol=1e-4, atol=1e-6), (loss1, ref1)

    # Case 2: multi-tile grid with T-padding (24 x 520 -> 3 x 5 grid of 8x128
    # tiles), scattered NaN targets, masked path.
    B2, T2 = 24, 520
    y2 = jax.random.normal(k3, (B2, T2, 1), dtype=jnp.float32)
    nan_pos = jax.random.bernoulli(k4, 0.1, (B2, T2, 1))
    y2 = jnp.where(nan_pos, jnp.nan, y2)
    yh2 = jax.random.normal(jax.random.fold_in(k4, 1), (B2, T2, Q), dtype=jnp.float32)

    loss2 = jax.block_until_ready(
        multi_quantile_loss(y2, yh2, quantiles, tile_b=8, tile_t=128))
    ref2 = jax.block_until_ready(_reference_loss(y2, yh2, quantiles))
    assert jnp.allclose(loss2, ref2, rtol=1e-4, atol=1e-6), (loss2, ref2)

    # Case 3: unmasked path (NaN-free targets) exercising the iota bounds mask
    # with padding.
    y3 = jax.random.normal(jax.random.fold_in(key, 7), (B2, T2, 1), dtype=jnp.float32)
    loss3 = jax.block_until_ready(
        multi_quantile_loss(y3, yh2, quantiles, masked_loss=False,
                            tile_b=8, tile_t=128))
    ref3 = jax.block_until_ready(
        _reference_loss(y3, yh2, quantiles, masked_loss=False))
    assert jnp.allclose(loss3, ref3, rtol=1e-4, atol=1e-6), (loss3, ref3)

    print("KERNEL_OK")
</pallas_src>

<mosaic_0001>
module attributes {stable_mosaic.version = 11 : i64} {
  func.func @_mql_kernel(%arg0: i32, %arg1: i32, %arg2: memref<8x128xf32, #tpu.memory_space<vmem>>, %arg3: memref<3x8x128xf32, #tpu.memory_space<vmem>>, %arg4: memref<1x1xf32, #tpu.memory_space<vmem>>, %arg5: memref<1x1xf32, #tpu.memory_space<vmem>>, %arg6: memref<1x1xf32, #tpu.memory_space<vmem>>) attributes {dimension_semantics = [#tpu.dimension_semantics<arbitrary>, #tpu.dimension_semantics<arbitrary>], iteration_bounds = array<i64: 1, 1>, scalar_prefetch = 0 : i64, scratch_operands = 2 : i64, tpu.core_type = #tpu.core_type<tc>, window_params = [{transform_indices = @transform_0, window_bounds = array<i64: 8, 128>}, {transform_indices = @transform_1, window_bounds = array<i64: 3, 8, 128>}, {pipeline_mode = #tpu.pipeline_mode<synchronous>, transform_indices = @transform_2, window_bounds = array<i64: 1, 1>}]} {
    %c0_i32 = arith.constant 0 : i32
    %0 = arith.cmpi eq, %arg0, %c0_i32 : i32
    %c0_i32_0 = arith.constant 0 : i32
    %1 = arith.cmpi eq, %arg1, %c0_i32_0 : i32
    %2 = arith.andi %0, %1 : i1
    %3 = arith.extui %2 : i1 to i32
    %c0_i32_1 = arith.constant 0 : i32
    %4 = arith.cmpi ne, %3, %c0_i32_1 : i32
    scf.if %4 {
      %cst_33 = arith.constant 0.000000e+00 : f32
      %71 = vector.broadcast %cst_33 : f32 to vector<1x1xf32>
      %c0_34 = arith.constant 0 : index
      %c0_35 = arith.constant 0 : index
      %72 = vector.load %arg5[%c0_34, %c0_35] : memref<1x1xf32, #tpu.memory_space<vmem>>, vector<1x1xf32>
      tpu.vector_store %arg5[%c0_34, %c0_35], %71 {strides = array<i32>} : memref<1x1xf32, #tpu.memory_space<vmem>>, vector<1x1xf32>,
      %cst_36 = arith.constant 0.000000e+00 : f32
      %73 = vector.broadcast %cst_36 : f32 to vector<1x1xf32>
      %c0_37 = arith.constant 0 : index
      %c0_38 = arith.constant 0 : index
      %74 = vector.load %arg6[%c0_37, %c0_38] : memref<1x1xf32, #tpu.memory_space<vmem>>, vector<1x1xf32>
      tpu.vector_store %arg6[%c0_37, %c0_38], %73 {strides = array<i32>} : memref<1x1xf32, #tpu.memory_space<vmem>>, vector<1x1xf32>,
    } else {
    }
    %c0 = arith.constant 0 : index
    %c0_2 = arith.constant 0 : index
    %5 = vector.load %arg2[%c0, %c0_2] : memref<8x128xf32, #tpu.memory_space<vmem>>, vector<8x128xf32>
    %6 = arith.cmpf one, %5, %5 : vector<8x128xf32>
    %cst = arith.constant dense<true> : vector<8x128xi1>
    %7 = arith.xori %6, %cst : vector<8x128xi1>
    %cst_3 = arith.constant 0.000000e+00 : f32
    %8 = vector.broadcast %cst_3 : f32 to vector<8x128xf32>
    %c0_4 = arith.constant 0 : index
    %c0_5 = arith.constant 0 : index
    %c0_6 = arith.constant 0 : index
    %9 = vector.load %arg3[%c0_4, %c0_5, %c0_6] : memref<3x8x128xf32, #tpu.memory_space<vmem>>, vector<1x8x128xf32>
    %10 = vector.shape_cast %9 : vector<1x8x128xf32> to vector<8x128xf32>
    %11 = arith.subf %5, %10 : vector<8x128xf32>
    %cst_7 = arith.constant 0.000000e+00 : f32
    %12 = vector.broadcast %cst_7 : f32 to vector<8x128xf32>
    %13 = arith.select %7, %11, %12 : vector<8x128xi1>, vector<8x128xf32>
    %cst_8 = arith.constant 0.000000e+00 : f32
    %14 = vector.broadcast %cst_8 : f32 to vector<8x128xf32>
    %15 = arith.cmpf olt, %13, %14 : vector<8x128xf32>
    %16 = arith.extui %15 : vector<8x128xi1> to vector<8x128xi32>
    %17 = arith.sitofp %16 : vector<8x128xi32> to vector<8x128xf32>
    %cst_9 = arith.constant 1.000000e-01 : f32
    %18 = vector.broadcast %cst_9 : f32 to vector<8x128xf32>
    %19 = arith.subf %18, %17 : vector<8x128xf32>
    %20 = arith.mulf %13, %19 : vector<8x128xf32>
    %21 = arith.addf %8, %20 : vector<8x128xf32>
    %c1 = arith.constant 1 : index
    %c0_10 = arith.constant 0 : index
    %c0_11 = arith.constant 0 : index
    %22 = vector.load %arg3[%c1, %c0_10, %c0_11] : memref<3x8x128xf32, #tpu.memory_space<vmem>>, vector<1x8x128xf32>
    %23 = vector.shape_cast %22 : vector<1x8x128xf32> to vector<8x128xf32>
    %24 = arith.subf %5, %23 : vector<8x128xf32>
    %cst_12 = arith.constant 0.000000e+00 : f32
    %25 = vector.broadcast %cst_12 : f32 to vector<8x128xf32>
    %26 = arith.select %7, %24, %25 : vector<8x128xi1>, vector<8x128xf32>
    %cst_13 = arith.constant 0.000000e+00 : f32
    %27 = vector.broadcast %cst_13 : f32 to vector<8x128xf32>
    %28 = arith.cmpf olt, %26, %27 : vector<8x128xf32>
    %29 = arith.extui %28 : vector<8x128xi1> to vector<8x128xi32>
    %30 = arith.sitofp %29 : vector<8x128xi32> to vector<8x128xf32>
    %cst_14 = arith.constant 5.000000e-01 : f32
    %31 = vector.broadcast %cst_14 : f32 to vector<8x128xf32>
    %32 = arith.subf %31, %30 : vector<8x128xf32>
    %33 = arith.mulf %26, %32 : vector<8x128xf32>
    %34 = arith.addf %21, %33 : vector<8x128xf32>
    %c2 = arith.constant 2 : index
    %c0_15 = arith.constant 0 : index
    %c0_16 = arith.constant 0 : index
    %35 = vector.load %arg3[%c2, %c0_15, %c0_16] : memref<3x8x128xf32, #tpu.memory_space<vmem>>, vector<1x8x128xf32>
    %36 = vector.shape_cast %35 : vector<1x8x128xf32> to vector<8x128xf32>
    %37 = arith.subf %5, %36 : vector<8x128xf32>
    %cst_17 = arith.constant 0.000000e+00 : f32
    %38 = vector.broadcast %cst_17 : f32 to vector<8x128xf32>
    %39 = arith.select %7, %37, %38 : vector<8x128xi1>, vector<8x128xf32>
    %cst_18 = arith.constant 0.000000e+00 : f32
    %40 = vector.broadcast %cst_18 : f32 to vector<8x128xf32>
    %41 = arith.cmpf olt, %39, %40 : vector<8x128xf32>
    %42 = arith.extui %41 : vector<8x128xi1> to vector<8x128xi32>
    %43 = arith.sitofp %42 : vector<8x128xi32> to vector<8x128xf32>
    %cst_19 = arith.constant 0.899999976 : f32
    %44 = vector.broadcast %cst_19 : f32 to vector<8x128xf32>
    %45 = arith.subf %44, %43 : vector<8x128xf32>
    %46 = arith.mulf %39, %45 : vector<8x128xf32>
    %47 = arith.addf %34, %46 : vector<8x128xf32>
    %c0_20 = arith.constant 0 : index
    %c0_21 = arith.constant 0 : index
    %48 = vector.load %arg5[%c0_20, %c0_21] : memref<1x1xf32, #tpu.memory_space<vmem>>, vector<1x1xf32>
    %49 = vector.shape_cast %47 : vector<8x128xf32> to vector<1x8x128xf32>
    %cst_22 = arith.constant dense<0.000000e+00> : vector<1xf32>
    %50 = vector.multi_reduction <add>, %49, %cst_22 [1, 2] : vector<1x8x128xf32> to vector<1xf32>
    %51 = vector.shape_cast %50 : vector<1xf32> to vector<1x1x1xf32>
    %52 = vector.extract %51[0, 0, 0] : f32 from vector<1x1x1xf32>
    %53 = vector.broadcast %52 : f32 to vector<1x1xf32>
    %54 = arith.addf %48, %53 : vector<1x1xf32>
    %c0_23 = arith.constant 0 : index
    %c0_24 = arith.constant 0 : index
    %55 = vector.load %arg5[%c0_23, %c0_24] : memref<1x1xf32, #tpu.memory_space<vmem>>, vector<1x1xf32>
    tpu.vector_store %arg5[%c0_23, %c0_24], %54 {strides = array<i32>} : memref<1x1xf32, #tpu.memory_space<vmem>>, vector<1x1xf32>,
    %c0_25 = arith.constant 0 : index
    %c0_26 = arith.constant 0 : index
    %56 = vector.load %arg6[%c0_25, %c0_26] : memref<1x1xf32, #tpu.memory_space<vmem>>, vector<1x1xf32>
    %57 = arith.extui %7 : vector<8x128xi1> to vector<8x128xi32>
    %58 = arith.sitofp %57 : vector<8x128xi32> to vector<8x128xf32>
    %59 = vector.shape_cast %58 : vector<8x128xf32> to vector<1x8x128xf32>
    %cst_27 = arith.constant dense<0.000000e+00> : vector<1xf32>
    %60 = vector.multi_reduction <add>, %59, %cst_27 [1, 2] : vector<1x8x128xf32> to vector<1xf32>
    %61 = vector.shape_cast %60 : vector<1xf32> to vector<1x1x1xf32>
    %62 = vector.extract %61[0, 0, 0] : f32 from vector<1x1x1xf32>
    %63 = vector.broadcast %62 : f32 to vector<1x1xf32>
    %64 = arith.addf %56, %63 : vector<1x1xf32>
    %c0_28 = arith.constant 0 : index
    %c0_29 = arith.constant 0 : index
    %65 = vector.load %arg6[%c0_28, %c0_29] : memref<1x1xf32, #tpu.memory_space<vmem>>, vector<1x1xf32>
    tpu.vector_store %arg6[%c0_28, %c0_29], %64 {strides = array<i32>} : memref<1x1xf32, #tpu.memory_space<vmem>>, vector<1x1xf32>,
    %c0_i32_30 = arith.constant 0 : i32
    %66 = arith.cmpi eq, %arg0, %c0_i32_30 : i32
    %c0_i32_31 = arith.constant 0 : i32
    %67 = arith.cmpi eq, %arg1, %c0_i32_31 : i32
    %68 = arith.andi %66, %67 : i1
    %69 = arith.extui %68 : i1 to i32
    %c0_i32_32 = arith.constant 0 : i32
    %70 = arith.cmpi ne, %69, %c0_i32_32 : i32
    scf.if %70 {
      %c0_33 = arith.constant 0 : index
      %c0_34 = arith.constant 0 : index
      %71 = vector.load %arg6[%c0_33, %c0_34] : memref<1x1xf32, #tpu.memory_space<vmem>>, vector<1x1xf32>
      %cst_35 = arith.constant 3.000000e+00 : f32
      %72 = vector.broadcast %cst_35 : f32 to vector<1x1xf32>
      %73 = arith.mulf %71, %72 : vector<1x1xf32>
      %c0_36 = arith.constant 0 : index
      %c0_37 = arith.constant 0 : index
      %74 = vector.load %arg5[%c0_36, %c0_37] : memref<1x1xf32, #tpu.memory_space<vmem>>, vector<1x1xf32>
      %75 = arith.divf %74, %73 : vector<1x1xf32>
      %c0_38 = arith.constant 0 : index
      %c0_39 = arith.constant 0 : index
      %76 = vector.load %arg4[%c0_38, %c0_39] : memref<1x1xf32, #tpu.memory_space<vmem>>, vector<1x1xf32>
      tpu.vector_store %arg4[%c0_38, %c0_39], %75 {strides = array<i32>} : memref<1x1xf32, #tpu.memory_space<vmem>>, vector<1x1xf32>,
    } else {
    }
    return
  }
  func.func @transform_0(%arg0: i32, %arg1: i32) -> (i32, i32) {
    %c0_i32 = arith.constant 0 : i32
    return %arg0, %arg1 : i32, i32
  }
  func.func @transform_1(%arg0: i32, %arg1: i32) -> (i32, i32, i32) {
    %c0_i32 = arith.constant 0 : i32
    %c0_i32_0 = arith.constant 0 : i32
    return %c0_i32, %arg0, %arg1 : i32, i32, i32
  }
  func.func @transform_2(%arg0: i32, %arg1: i32) -> (i32, i32) {
    %c0_i32 = arith.constant 0 : i32
    %c0_i32_0 = arith.constant 0 : i32
    %c0_i32_1 = arith.constant 0 : i32
    return %c0_i32, %c0_i32_0 : i32, i32
  }
}

</mosaic_0001>

<bundles_post_ra>
// kernel: multi_quantile_loss.1
= control target key start
LH: loop header
LB: loop body
LE: loop exit
PB: predicated region body
PF: predicated region fallthrough
CT: control target
= control target key end

     0   :  { %s191_s0 = inlined_call_operand.vmem [shape: f32[8,128], index: 0, kind: input, shape index: {}]   ;;  %s192_s1 = inlined_call_operand.vmem [shape: f32[3,8,128], index: 1, kind: input, shape index: {}]   ;;  %s193_s2 = inlined_call_operand.hbm [shape: f32[1,1], index: 2, kind: output, shape index: {}]  }
   0x1   :  { %v21_v0 = vld [vmem:[%s191_s0] sm:$0xff]  ;;  %v105_v2 = vld [vmem:[%s192_s1 + $0x8] sm:$0xff]  ;;  %v107_v5 = vld [vmem:[%s192_s1 + $0x10] sm:$0xff] }
   0x2   :  { %v24_v1 = vld [vmem:[%s192_s1] sm:$0xff]  ;;  %vm22_vm0 = vcmp.ne.f32.partialorder %v21_v0, %v21_v0  ;;  %v35_v4 = vsub.f32 %v21_v0, %v105_v2 }
   0x3   :  { %v25_v3 = vsub.f32 %v21_v0, %v24_v1 }
   0x4   :  { %7 = vsyncpa [#allocation5], 0  ;;  %vm141_vm1 = vmmov 1   ;;  %v45_v7 = vsub.f32 %v21_v0, %v107_v5  ;;  %v142_v11 = vmov 0.0   ;;  %vm18_vm6 = vcmask 0   ;;  %s143_s17 = smov [#allocation4]  }
   0x5   :  { %vm171_vm2 = vmxor %vm22_vm0, %vm141_vm1  ;;  %19 = vst.msk [vmem:[#allocation2] sm:$0x1] %vm18_vm6, %v142_v11  ;;  %s96_s18 = sshll.u32 %s143_s17, 4  ;;  %s97_s18 = int_to_ptr.vmem [resolvable:$true] %s96_s18 }
   0x6   :  { %v26_v8 = vsel %vm171_vm2, %v25_v3, 0.0  ;;  %v36_v9 = vsel %vm171_vm2, %v35_v4, 0.0  ;;  %v46_v10 = vsel %vm171_vm2, %v45_v7, 0.0  ;;  %v109_v23 = vsel %vm171_vm2, 1.0, %v142_v11  ;;  %20 = vst.msk [vmem:[#allocation3] sm:$0x1] %vm18_vm6, %v142_v11  ;;  %p124_p1 = scmp.lt.s32.totalorder %s97_s18, %s97_s18 }
   0x7   :  { %vm27_vm3 = vcmp.lt.f32.partialorder %v26_v8, 0.0  ;;  %vm37_vm4 = vcmp.lt.f32.partialorder %v36_v9, 0.0  ;;  %vm47_vm5 = vcmp.lt.f32.partialorder %v46_v10, 0.0  ;;  %s119_s19 = scalar_lea.vmem %s97_s18, 16  ;;  %s123_s20 = scalar_lea.vmem %s97_s18, 32 }
   0x8   :  { %v104_v12 = vsel %vm27_vm3, 1.0, %v142_v11  ;;  %v106_v13 = vsel %vm37_vm4, 1.0, %v142_v11  ;;  %v108_v16 = vsel %vm47_vm5, 1.0, %v142_v11  ;;  %p120_p0 = scmp.ne.s32.totalorder %s97_s18, %s119_s19  ;;  %p125_p2 = scmp.lt.s32.totalorder %s123_s20, %s119_s19 }
   0x9   :  { %v30_v14 = vsub.f32 0.1, %v104_v12  ;;  %v40_v15 = vsub.f32 0.5, %v106_v13  ;;  %v50_v17 = vsub.f32 0.9, %v108_v16 }
   0xa   :  { %p126_p3 = por %p125_p2, %p124_p1 }
   0xb   :  { %v31_v18 = vmul.f32 %v30_v14, %v26_v8  ;;  %v41_v19 = vmul.f32 %v40_v15, %v36_v9  ;;  %v51_v20 = vmul.f32 %v50_v17, %v46_v10 }
   0xc   :  { %v53_v38 = vld [vmem:[#allocation2] sm:$0x1]  ;;  %p127_p4 = pnand %p126_p3, %p120_p0 }
   0xd   :  { %v42_v21 = vadd.f32 %v41_v19, %v31_v18  ;;  %v67_v41 = vld [vmem:[#allocation3] sm:$0x1] }
   0xf   :  { %v52_v22 = vadd.f32 %v51_v20, %v42_v21 }
  0x11   :  { %54 = vadd.xlane.f32.xlu0 %v52_v22 }
  0x15   :  { %70 = vadd.xlane.f32.xlu0 %v109_v23 }
  0x9a   :  { %v55_v24 = vpop.xlane.xlu0 %54 }
  0x9b   :  { %v56_v25 = vrot.slane %v55_v24, 4 }
  0x9d   :  { %v57_v26 = vadd.f32 %v56_v25, %v55_v24 }
  0x9e   :  { %v71_v27 = vpop.xlane.xlu0 %70 }
  0x9f   :  { %v58_v28 = vrot.slane %v57_v26, 2  ;;  %v72_v29 = vrot.slane %v71_v27, 4 }
  0xa1   :  { %v73_v30 = vadd.f32 %v72_v29, %v71_v27  ;;  %v59_v31 = vadd.f32 %v58_v28, %v57_v26 }
  0xa3   :  { %v74_v32 = vrot.slane %v73_v30, 2  ;;  %v60_v33 = vrot.slane %v59_v31, 1 }
  0xa5   :  { %v75_v34 = vadd.f32 %v74_v32, %v73_v30  ;;  %v61_v35 = vadd.f32 %v60_v33, %v59_v31 }
  0xa7   :  { %110 = vpush %v61_v35  ;;  %v76_v36 = vrot.slane %v75_v34, 1 }
  0xa9   :  { %v77_v37 = vadd.f32 %v76_v36, %v75_v34 }
  0xab   :  { %112 = vpush %v77_v37 }
  0xd8   :  { %s111_s0 = spop %110 }
  0xd9   :  { %v63_v39 = vstv %s111_s0 }
  0xda   :  { %v64_v40 = vadd.f32 %v63_v39, %v53_v38 }
  0xdc   :  { %66 = vst.msk [vmem:[#allocation2] sm:$0x1] %vm18_vm6, %v64_v40  ;;  %s113_s1 = spop %112 }
  0xdd   :  { %v79_v42 = vstv %s113_s1 }
  0xde   :  { %v80_v43 = vadd.f32 %v79_v42, %v67_v41 }
  0xe0   :  { %81 = vst.msk [vmem:[#allocation3] sm:$0x1] %vm18_vm6, %v80_v43 }
  0xe3   :  { %v86_v47 = vld [vmem:[#allocation2] sm:$0x1] }
  0xe7   :  { %v84_v44 = vld [vmem:[#allocation3] sm:$0x1] }
  0xe8   :  { %v85_v45 = vmul.f32 3.0, %v84_v44 }
  0xea   :  { %117 = vrcp.f32 %v85_v45 }
  0xf7   :  { %v118_v46 = vpop.eup %117 }
  0xf8   :  { %v88_v48 = vmul.f32 %v118_v46, %v86_v47 }
  0xfa   :  { %89 = vst.msk [vmem:[#allocation4] sm:$0x1] %vm18_vm6, %v88_v48 }
  0xfb   :  { %130 = shalt.err (!%p127_p4)
}
  0xfc   :  { %99 = dma.vmem_to_hbm [thread:$0]  %s97_s18, 16, %s193_s2, [#allocation5]  }
  0xfd   :  { %139 = dma.done.wait [#allocation5], 16  }
  0xfe   :  { %140 = vsyncadd [#allocation5], 4294967280 }
  0xff   :  { %103 = vsyncpa [#allocation5], 1 }

</bundles_post_ra>
